<compile_context>
chip_gen: v5e
topology: v5e:2x2
jax: 0.10.0
libtpu: 0.0.40
codegen_flags: <defaults>
</compile_context>

<pallas_src>
import functools

import jax
import jax.numpy as jnp
from jax import lax
from jax.experimental import pallas as pl
from jax.experimental.pallas import tpu as pltpu


def _round_up(x, m):
    return ((x + m - 1) // m) * m


def _cdiv(a, b):
    return -(-a // b)


# ----------------------------------------------------------------------------
# Pallas kernel.
# Grid = (batch tiles [parallel], state-head N tiles [arbitrary, innermost]).
# Shared MLP + fused head layer 1 + reward/gamma head run once per batch tile
# (j == 0); the state-head second layer is tiled over its output dim.
# ----------------------------------------------------------------------------
def _transition_kernel(
    x_ref,                               # (tb, cb_flat)   bf16 flat embeddings
    acts_ref,                            # (tb, 1)         int32 discrete action
    w1e_ref,                             # (cb_flat, H0)   bf16
    w1a_ref,                             # (act_pad, H0)   bf16
    b1_ref,                              # (1, H0)         f32
    w2_ref, b2_ref,                      # (H0, H1) bf16, (1, H1) f32
    wh1_ref, bh1_ref,                    # fused head layer 1: (H1, hh_dim) bf16, (1, hh_dim) f32
    ws2_ref, bs2_ref,                    # state head layer 2 tile: (s_pad, tn) bf16, (1, tn) f32
    wrg2_ref, brg2_ref,                  # fused reward/gamma layer 2: (rg_pad, 128) bf16, (1, 128) f32
    state_ref,                           # out: (tb, tn)   f32
    rg_ref,                              # out: (tb, 128)  f32  col0=reward, col1=gamma pre-sigmoid
    sh_ref,                              # scratch: (tb, s_pad) bf16 state-head hidden
):
    j = pl.program_id(1)
    s_pad = sh_ref.shape[1]

    @pl.when(j == 0)
    def _():
        tb = x_ref.shape[0]
        act_pad = w1a_ref.shape[0]
        # shared layer 1: embeddings matmul + in-kernel one-hot(acts) matmul + bias
        onehot = (
            lax.broadcasted_iota(jnp.int32, (tb, act_pad), 1) == acts_ref[...]
        ).astype(jnp.bfloat16)
        h = jnp.dot(x_ref[...], w1e_ref[...], preferred_element_type=jnp.float32)
        h = h + jnp.dot(onehot, w1a_ref[...], preferred_element_type=jnp.float32)
        h = jnp.maximum(h + b1_ref[...], 0.0).astype(jnp.bfloat16)
        # shared layer 2
        h = jnp.dot(h, w2_ref[...], preferred_element_type=jnp.float32) + b2_ref[...]
        h = jnp.maximum(h, 0.0).astype(jnp.bfloat16)
        # fused head first layer: [state | reward | gamma] hidden in one matmul
        hh = jnp.dot(h, wh1_ref[...], preferred_element_type=jnp.float32) + bh1_ref[...]
        hh = jnp.maximum(hh, 0.0)
        sh_ref[...] = hh[:, :s_pad].astype(jnp.bfloat16)          # 128-aligned slice
        # reward + gamma second layers fused (block-diagonal) -> lane-dense (tb, 128)
        rg_hidden = hh[:, s_pad:].astype(jnp.bfloat16)
        rg_ref[...] = (
            jnp.dot(rg_hidden, wrg2_ref[...], preferred_element_type=jnp.float32)
            + brg2_ref[...]
        )

    # state head second layer for this (tb, tn) output tile
    state_ref[...] = (
        jnp.dot(sh_ref[...], ws2_ref[...], preferred_element_type=jnp.float32)
        + bs2_ref[...]
    )


# ----------------------------------------------------------------------------
# Parameter construction (PyTorch-Linear-style uniform init).
# Weights stored (in_features, out_features) so the kernel does y = x @ W + b.
# ----------------------------------------------------------------------------
def _linear_params(key, fan_in, fan_out):
    kw, kb = jax.random.split(key)
    bound = 1.0 / jnp.sqrt(jnp.float32(fan_in))
    w = jax.random.uniform(kw, (fan_in, fan_out), jnp.float32, -bound, bound)
    b = jax.random.uniform(kb, (1, fan_out), jnp.float32, -bound, bound)
    return w, b


def init_params(
    key,
    input_dim,
    n_embeddings,
    embedding_dim,
    act_dim,
    hidden_sizes=(256, 256),
    state_head_size=None,
    reward_head_size=64,
    gamma_head_size=64,
):
    cb_flat_dim = input_dim * embedding_dim
    state_head_size = state_head_size or hidden_sizes[-1]
    keys = jax.random.split(key, 9)

    params = {}
    params["embedding"] = jax.random.normal(
        keys[0], (n_embeddings, embedding_dim), jnp.float32
    )
    in_dim = cb_flat_dim + act_dim
    params["w1"], params["b1"] = _linear_params(keys[1], in_dim, hidden_sizes[0])
    params["w2"], params["b2"] = _linear_params(keys[2], hidden_sizes[0], hidden_sizes[1])
    h_last = hidden_sizes[-1]
    params["ws1"], params["bs1"] = _linear_params(keys[3], h_last, state_head_size)
    params["ws2"], params["bs2"] = _linear_params(
        keys[4], state_head_size, n_embeddings * input_dim
    )
    params["wr1"], params["br1"] = _linear_params(keys[5], h_last, reward_head_size)
    params["wr2"], params["br2"] = _linear_params(keys[6], reward_head_size, 1)
    params["wg1"], params["bg1"] = _linear_params(keys[7], h_last, gamma_head_size)
    params["wg2"], params["bg2"] = _linear_params(keys[8], gamma_head_size, 1)
    return params


# ----------------------------------------------------------------------------
# One-time fusion / padding / bf16 casting of parameters into kernel layout.
# ----------------------------------------------------------------------------
def fuse_params(params, *, input_dim, compute_dtype=jnp.bfloat16):
    emb = params["embedding"]
    e_dim = emb.shape[1]
    cb_flat = input_dim * e_dim

    w1 = params["w1"]
    h0 = w1.shape[1]
    act_dim = w1.shape[0] - cb_flat
    act_pad = _round_up(act_dim, 8)
    w1e = w1[:cb_flat].astype(compute_dtype)                       # (cb_flat, H0)
    w1a = (
        jnp.zeros((act_pad, h0), compute_dtype)
        .at[:act_dim]
        .set(w1[cb_flat:].astype(compute_dtype))
    )

    h1 = params["w2"].shape[1]
    ws1, bs1 = params["ws1"], params["bs1"]
    wr1, br1 = params["wr1"], params["br1"]
    wg1, bg1 = params["wg1"], params["bg1"]
    s_size, r_size, g_size = ws1.shape[1], wr1.shape[1], wg1.shape[1]
    s_pad = _round_up(s_size, 128)
    r_pad = _round_up(r_size, 128)
    g_pad = _round_up(g_size, 128)
    hh_dim = s_pad + r_pad + g_pad

    wh1 = jnp.zeros((h1, hh_dim), jnp.float32)
    wh1 = wh1.at[:, :s_size].set(ws1)
    wh1 = wh1.at[:, s_pad:s_pad + r_size].set(wr1)
    wh1 = wh1.at[:, s_pad + r_pad:s_pad + r_pad + g_size].set(wg1)
    bh1 = jnp.zeros((1, hh_dim), jnp.float32)
    bh1 = bh1.at[:, :s_size].set(bs1)
    bh1 = bh1.at[:, s_pad:s_pad + r_size].set(br1)
    bh1 = bh1.at[:, s_pad + r_pad:s_pad + r_pad + g_size].set(bg1)

    ws2, bs2 = params["ws2"], params["bs2"]
    state_flat = ws2.shape[1]
    state_pad = _round_up(state_flat, 128)
    ws2_p = jnp.zeros((s_pad, state_pad), jnp.float32).at[:s_size, :state_flat].set(ws2)
    bs2_p = jnp.zeros((1, state_pad), jnp.float32).at[:, :state_flat].set(bs2)

    wr2, br2 = params["wr2"], params["br2"]
    wg2, bg2 = params["wg2"], params["bg2"]
    wrg2 = jnp.zeros((r_pad + g_pad, 128), jnp.float32)
    wrg2 = wrg2.at[:r_size, 0].set(wr2[:, 0])
    wrg2 = wrg2.at[r_pad:r_pad + g_size, 1].set(wg2[:, 0])
    brg2 = jnp.zeros((1, 128), jnp.float32)
    brg2 = brg2.at[0, 0].set(br2[0, 0])
    brg2 = brg2.at[0, 1].set(bg2[0, 0])

    return {
        "embedding": emb.astype(compute_dtype),
        "w1e": w1e, "w1a": w1a, "b1": params["b1"],
        "w2": params["w2"].astype(compute_dtype), "b2": params["b2"],
        "wh1": wh1.astype(compute_dtype), "bh1": bh1,
        "ws2": ws2_p.astype(compute_dtype), "bs2": bs2_p,
        "wrg2": wrg2.astype(compute_dtype), "brg2": brg2,
    }


# ----------------------------------------------------------------------------
# Tile-size heuristics.
# ----------------------------------------------------------------------------
def _choose_batch_tile(B):
    if B <= 8:
        return 8
    # >= 2 tiles so the "parallel" batch axis feeds both v7x TensorCores;
    # cap at 512 and round to sublanes so b_pad - B padding stays small.
    n_tiles = max(2, _cdiv(B, 512))
    return min(512, _round_up(_cdiv(B, n_tiles), 8))


def _choose_state_tile(state_pad):
    if state_pad <= 2048:
        return state_pad
    for cand in range(2048, 127, -128):
        if state_pad % cand == 0:
            return cand
    return 128


# ----------------------------------------------------------------------------
# Forward wrapper (minimal XLA glue, hot path in Pallas).
# ----------------------------------------------------------------------------
@functools.partial(jax.jit, static_argnames=("input_dim", "n_embeddings"))
def discrete_transition_forward(fused, x, acts, *, input_dim, n_embeddings):
    # x: (B, input_dim) int32 codebook indices; acts: (B,) int32 discrete acts.
    B = x.shape[0]
    emb = fused["embedding"]
    cb_flat = input_dim * emb.shape[1]
    act_pad, h0 = fused["w1a"].shape
    h1 = fused["w2"].shape[1]
    hh_dim = fused["wh1"].shape[1]
    s_pad, state_pad = fused["ws2"].shape
    rg_pad = fused["wrg2"].shape[0]

    tb = _choose_batch_tile(B)
    b_pad = _round_up(B, tb)
    grid_b = b_pad // tb
    tn = _choose_state_tile(state_pad)
    grid_n = state_pad // tn

    # glue (fuses into a couple of small XLA ops): embedding gather + flatten.
    flat = jnp.take(emb, x, axis=0).reshape(B, cb_flat)
    x_in = jnp.zeros((b_pad, cb_flat), emb.dtype).at[:B].set(flat)
    acts_in = jnp.zeros((b_pad, 1), jnp.int32).at[:B, 0].set(acts.astype(jnp.int32))

    weight_keys = ("w1e", "w1a", "b1", "w2", "b2", "wh1", "bh1",
                   "ws2", "bs2", "wrg2", "brg2")
    weights = [fused[k] for k in weight_keys]

    flops = 2 * b_pad * (
        cb_flat * h0 + act_pad * h0 + h0 * h1 + h1 * hh_dim
        + s_pad * state_pad + rg_pad * 128
    )
    bytes_accessed = (
        x_in.size * x_in.dtype.itemsize
        + acts_in.size * acts_in.dtype.itemsize
        + sum(int(w.size) * w.dtype.itemsize for w in weights)
        + 4 * (b_pad * state_pad + b_pad * 128)
    )

    in_specs = [
        pl.BlockSpec((tb, cb_flat), lambda i, j: (i, 0)),        # x (lane-dense, unpadded)
        pl.BlockSpec((tb, 1), lambda i, j: (i, 0)),              # acts
        pl.BlockSpec((cb_flat, h0), lambda i, j: (0, 0)),        # w1e
        pl.BlockSpec((act_pad, h0), lambda i, j: (0, 0)),        # w1a
        pl.BlockSpec((1, h0), lambda i, j: (0, 0)),              # b1
        pl.BlockSpec((h0, h1), lambda i, j: (0, 0)),             # w2
        pl.BlockSpec((1, h1), lambda i, j: (0, 0)),              # b2
        pl.BlockSpec((h1, hh_dim), lambda i, j: (0, 0)),         # wh1
        pl.BlockSpec((1, hh_dim), lambda i, j: (0, 0)),          # bh1
        pl.BlockSpec((s_pad, tn), lambda i, j: (0, j)),          # ws2 (N-tiled)
        pl.BlockSpec((1, tn), lambda i, j: (0, j)),              # bs2 (N-tiled)
        pl.BlockSpec((rg_pad, 128), lambda i, j: (0, 0)),        # wrg2
        pl.BlockSpec((1, 128), lambda i, j: (0, 0)),             # brg2
    ]
    out_specs = (
        pl.BlockSpec((tb, tn), lambda i, j: (i, j)),             # state logits tile
        pl.BlockSpec((tb, 128), lambda i, j: (i, 0)),            # reward/gamma slab
    )

    state_p, rg = pl.pallas_call(
        _transition_kernel,
        out_shape=(
            jax.ShapeDtypeStruct((b_pad, state_pad), jnp.float32),
            jax.ShapeDtypeStruct((b_pad, 128), jnp.float32),
        ),
        grid=(grid_b, grid_n),
        in_specs=in_specs,
        out_specs=out_specs,
        scratch_shapes=[pltpu.VMEM((tb, s_pad), jnp.bfloat16)],
        compiler_params=pltpu.CompilerParams(
            dimension_semantics=("parallel", "arbitrary"),
            vmem_limit_bytes=48 * 1024 * 1024,
        ),
        cost_estimate=pl.CostEstimate(
            flops=int(flops), transcendentals=0, bytes_accessed=int(bytes_accessed)
        ),
    )(x_in, acts_in, *weights)

    state_flat_dim = n_embeddings * input_dim
    state_logits = state_p[:B, :state_flat_dim].reshape(B, n_embeddings, input_dim)
    reward = rg[:B, 0:1]
    gamma = jax.nn.sigmoid(rg[:B, 1:2])   # sigmoid on one column in the wrapper
    return state_logits, reward, gamma


# ----------------------------------------------------------------------------
# Pure-JAX f32 reference (unfused params) for a sanity check.
# ----------------------------------------------------------------------------
def _reference_forward(params, x, acts, *, input_dim, n_embeddings, act_dim):
    B = x.shape[0]
    flat_embeds = jnp.take(params["embedding"], x, axis=0).reshape(B, -1)
    acts_oh = jax.nn.one_hot(acts, act_dim, dtype=jnp.float32)
    h = jnp.concatenate([flat_embeds, acts_oh], axis=1)
    h = jnp.maximum(h @ params["w1"] + params["b1"], 0.0)
    h = jnp.maximum(h @ params["w2"] + params["b2"], 0.0)
    s = jnp.maximum(h @ params["ws1"] + params["bs1"], 0.0)
    state = (s @ params["ws2"] + params["bs2"]).reshape(B, n_embeddings, input_dim)
    r = jnp.maximum(h @ params["wr1"] + params["br1"], 0.0)
    reward = r @ params["wr2"] + params["br2"]
    g = jnp.maximum(h @ params["wg1"] + params["bg1"], 0.0)
    gamma = jax.nn.sigmoid(g @ params["wg2"] + params["bg2"])
    return state, reward, gamma


if __name__ == "__main__":
    # Small config consistent with the module's __init__.
    B = 8
    input_dim = 4
    n_embeddings = 16
    embedding_dim = 8
    act_dim = 6            # spaces.Discrete(6)
    hidden_sizes = (256, 256)

    key = jax.random.PRNGKey(0)
    kp, kx, ka = jax.random.split(key, 3)

    params = init_params(
        kp, input_dim, n_embeddings, embedding_dim, act_dim,
        hidden_sizes=hidden_sizes,
    )
    fused = fuse_params(params, input_dim=input_dim)

    x = jax.random.randint(kx, (B, input_dim), 0, n_embeddings, dtype=jnp.int32)
    acts = jax.random.randint(ka, (B,), 0, act_dim, dtype=jnp.int32)

    state_logits, reward, gamma = discrete_transition_forward(
        fused, x, acts, input_dim=input_dim, n_embeddings=n_embeddings,
    )
    jax.block_until_ready((state_logits, reward, gamma))

    # correctness check against pure-JAX f32 reference (kernel uses bf16 MXU
    # operands with f32 accumulation, so tolerance is loosened vs the old 1e-4).
    ref_state, ref_reward, ref_gamma = _reference_forward(
        params, x, acts,
        input_dim=input_dim, n_embeddings=n_embeddings, act_dim=act_dim,
    )
    assert state_logits.shape == (B, n_embeddings, input_dim)
    assert reward.shape == (B, 1) and gamma.shape == (B, 1)
    assert jnp.allclose(state_logits, ref_state, atol=3e-2, rtol=3e-2)
    assert jnp.allclose(reward, ref_reward, atol=3e-2, rtol=3e-2)
    assert jnp.allclose(gamma, ref_gamma, atol=3e-2, rtol=3e-2)

    print("KERNEL_OK")
</pallas_src>

<mosaic_0001>
module attributes {stable_mosaic.version = 11 : i64} {
  func.func @_transition_kernel(%arg0: i32, %arg1: i32, %arg2: memref<8x32xbf16, #tpu.memory_space<vmem>>, %arg3: memref<8x1xi32, #tpu.memory_space<vmem>>, %arg4: memref<32x256xbf16, #tpu.memory_space<vmem>>, %arg5: memref<8x256xbf16, #tpu.memory_space<vmem>>, %arg6: memref<1x256xf32, #tpu.memory_space<vmem>>, %arg7: memref<256x256xbf16, #tpu.memory_space<vmem>>, %arg8: memref<1x256xf32, #tpu.memory_space<vmem>>, %arg9: memref<256x512xbf16, #tpu.memory_space<vmem>>, %arg10: memref<1x512xf32, #tpu.memory_space<vmem>>, %arg11: memref<256x128xbf16, #tpu.memory_space<vmem>>, %arg12: memref<1x128xf32, #tpu.memory_space<vmem>>, %arg13: memref<256x128xbf16, #tpu.memory_space<vmem>>, %arg14: memref<1x128xf32, #tpu.memory_space<vmem>>, %arg15: memref<8x128xf32, #tpu.memory_space<vmem>>, %arg16: memref<8x128xf32, #tpu.memory_space<vmem>>, %arg17: memref<8x256xbf16, #tpu.memory_space<vmem>>) attributes {dimension_semantics = [#tpu.dimension_semantics<parallel>, #tpu.dimension_semantics<arbitrary>], iteration_bounds = array<i64: 1, 1>, scalar_prefetch = 0 : i64, scratch_operands = 1 : i64, tpu.core_type = #tpu.core_type<tc>, window_params = [{transform_indices = @transform_0, window_bounds = array<i64: 8, 32>}, {transform_indices = @transform_1, window_bounds = array<i64: 8, 1>}, {pipeline_mode = #tpu.pipeline_mode<synchronous>, transform_indices = @transform_2, window_bounds = array<i64: 32, 256>}, {pipeline_mode = #tpu.pipeline_mode<synchronous>, transform_indices = @transform_3, window_bounds = array<i64: 8, 256>}, {pipeline_mode = #tpu.pipeline_mode<synchronous>, transform_indices = @transform_4, window_bounds = array<i64: 1, 256>}, {pipeline_mode = #tpu.pipeline_mode<synchronous>, transform_indices = @transform_5, window_bounds = array<i64: 256, 256>}, {pipeline_mode = #tpu.pipeline_mode<synchronous>, transform_indices = @transform_6, window_bounds = array<i64: 1, 256>}, {pipeline_mode = #tpu.pipeline_mode<synchronous>, transform_indices = @transform_7, window_bounds = array<i64: 256, 512>}, {pipeline_mode = #tpu.pipeline_mode<synchronous>, transform_indices = @transform_8, window_bounds = array<i64: 1, 512>}, {transform_indices = @transform_9, window_bounds = array<i64: 256, 128>}, {transform_indices = @transform_10, window_bounds = array<i64: 1, 128>}, {pipeline_mode = #tpu.pipeline_mode<synchronous>, transform_indices = @transform_11, window_bounds = array<i64: 256, 128>}, {pipeline_mode = #tpu.pipeline_mode<synchronous>, transform_indices = @transform_12, window_bounds = array<i64: 1, 128>}, {transform_indices = @transform_13, window_bounds = array<i64: 8, 128>}, {transform_indices = @transform_14, window_bounds = array<i64: 8, 128>}]} {
    %c0_i32 = arith.constant 0 : i32
    %0 = arith.cmpi eq, %arg1, %c0_i32 : i32
    %1 = arith.extui %0 : i1 to i32
    %c0_i32_0 = arith.constant 0 : i32
    %2 = arith.cmpi ne, %1, %c0_i32_0 : i32
    scf.if %2 {
      %10 = tpu.iota {dimensions = array<i32: 1>} : vector<8x8xi32>
      %c0_8 = arith.constant 0 : index
      %c0_9 = arith.constant 0 : index
      %11 = vector.load %arg3[%c0_8, %c0_9] : memref<8x1xi32, #tpu.memory_space<vmem>>, vector<8x1xi32>
      %12 = vector.broadcast %11 : vector<8x1xi32> to vector<8x8xi32>
      %13 = arith.cmpi eq, %10, %12 : vector<8x8xi32>
      %14 = arith.extui %13 : vector<8x8xi1> to vector<8x8xi32>
      %15 = arith.sitofp %14 : vector<8x8xi32> to vector<8x8xf32>
      %16 = arith.truncf %15 : vector<8x8xf32> to vector<8x8xbf16>
      %c0_10 = arith.constant 0 : index
      %c0_11 = arith.constant 0 : index
      %17 = vector.load %arg2[%c0_10, %c0_11] : memref<8x32xbf16, #tpu.memory_space<vmem>>, vector<8x32xbf16>
      %c0_12 = arith.constant 0 : index
      %c0_13 = arith.constant 0 : index
      %18 = vector.load %arg4[%c0_12, %c0_13] : memref<32x256xbf16, #tpu.memory_space<vmem>>, vector<32x256xbf16>
      %cst_14 = arith.constant dense<0.000000e+00> : vector<8x256xf32>
      %19 = tpu.matmul %17, %18, %cst_14 {dimension_numbers = #tpu.dot_dimension_numbers<[1], [0], [0], [1], [0, 0, 1, 1], [], []>} : vector<8x32xbf16>, vector<32x256xbf16>, vector<8x256xf32> -> vector<8x256xf32>
      %c0_15 = arith.constant 0 : index
      %c0_16 = arith.constant 0 : index
      %20 = vector.load %arg5[%c0_15, %c0_16] : memref<8x256xbf16, #tpu.memory_space<vmem>>, vector<8x256xbf16>
      %cst_17 = arith.constant dense<0.000000e+00> : vector<8x256xf32>
      %21 = tpu.matmul %16, %20, %cst_17 {dimension_numbers = #tpu.dot_dimension_numbers<[1], [0], [0], [1], [0, 0, 1, 1], [], []>} : vector<8x8xbf16>, vector<8x256xbf16>, vector<8x256xf32> -> vector<8x256xf32>
      %22 = arith.addf %19, %21 : vector<8x256xf32>
      %c0_18 = arith.constant 0 : index
      %c0_19 = arith.constant 0 : index
      %23 = vector.load %arg6[%c0_18, %c0_19] : memref<1x256xf32, #tpu.memory_space<vmem>>, vector<1x256xf32>
      %24 = vector.broadcast %23 : vector<1x256xf32> to vector<8x256xf32>
      %25 = arith.addf %22, %24 : vector<8x256xf32>
      %cst_20 = arith.constant 0.000000e+00 : f32
      %26 = vector.broadcast %cst_20 : f32 to vector<8x256xf32>
      %27 = arith.maximumf %25, %26 : vector<8x256xf32>
      %28 = arith.truncf %27 : vector<8x256xf32> to vector<8x256xbf16>
      %c0_21 = arith.constant 0 : index
      %c0_22 = arith.constant 0 : index
      %29 = vector.load %arg7[%c0_21, %c0_22] : memref<256x256xbf16, #tpu.memory_space<vmem>>, vector<256x256xbf16>
      %cst_23 = arith.constant dense<0.000000e+00> : vector<8x256xf32>
      %30 = tpu.matmul %28, %29, %cst_23 {dimension_numbers = #tpu.dot_dimension_numbers<[1], [0], [0], [1], [0, 0, 1, 1], [], []>} : vector<8x256xbf16>, vector<256x256xbf16>, vector<8x256xf32> -> vector<8x256xf32>
      %c0_24 = arith.constant 0 : index
      %c0_25 = arith.constant 0 : index
      %31 = vector.load %arg8[%c0_24, %c0_25] : memref<1x256xf32, #tpu.memory_space<vmem>>, vector<1x256xf32>
      %32 = vector.broadcast %31 : vector<1x256xf32> to vector<8x256xf32>
      %33 = arith.addf %30, %32 : vector<8x256xf32>
      %cst_26 = arith.constant 0.000000e+00 : f32
      %34 = vector.broadcast %cst_26 : f32 to vector<8x256xf32>
      %35 = arith.maximumf %33, %34 : vector<8x256xf32>
      %36 = arith.truncf %35 : vector<8x256xf32> to vector<8x256xbf16>
      %c0_27 = arith.constant 0 : index
      %c0_28 = arith.constant 0 : index
      %37 = vector.load %arg9[%c0_27, %c0_28] : memref<256x512xbf16, #tpu.memory_space<vmem>>, vector<256x512xbf16>
      %cst_29 = arith.constant dense<0.000000e+00> : vector<8x512xf32>
      %38 = tpu.matmul %36, %37, %cst_29 {dimension_numbers = #tpu.dot_dimension_numbers<[1], [0], [0], [1], [0, 0, 1, 1], [], []>} : vector<8x256xbf16>, vector<256x512xbf16>, vector<8x512xf32> -> vector<8x512xf32>
      %c0_30 = arith.constant 0 : index
      %c0_31 = arith.constant 0 : index
      %39 = vector.load %arg10[%c0_30, %c0_31] : memref<1x512xf32, #tpu.memory_space<vmem>>, vector<1x512xf32>
      %40 = vector.broadcast %39 : vector<1x512xf32> to vector<8x512xf32>
      %41 = arith.addf %38, %40 : vector<8x512xf32>
      %cst_32 = arith.constant 0.000000e+00 : f32
      %42 = vector.broadcast %cst_32 : f32 to vector<8x512xf32>
      %43 = arith.maximumf %41, %42 : vector<8x512xf32>
      %44 = vector.extract_strided_slice %43 {offsets = [0, 0], sizes = [8, 256], strides = [1, 1]} : vector<8x512xf32> to vector<8x256xf32>
      %45 = arith.truncf %44 : vector<8x256xf32> to vector<8x256xbf16>
      %c0_33 = arith.constant 0 : index
      %c0_34 = arith.constant 0 : index
      %46 = vector.load %arg17[%c0_33, %c0_34] : memref<8x256xbf16, #tpu.memory_space<vmem>>, vector<8x256xbf16>
      tpu.vector_store %arg17[%c0_33, %c0_34], %45 {strides = array<i32>} : memref<8x256xbf16, #tpu.memory_space<vmem>>, vector<8x256xbf16>,
      %47 = vector.extract_strided_slice %43 {offsets = [0, 256], sizes = [8, 256], strides = [1, 1]} : vector<8x512xf32> to vector<8x256xf32>
      %48 = arith.truncf %47 : vector<8x256xf32> to vector<8x256xbf16>
      %c0_35 = arith.constant 0 : index
      %c0_36 = arith.constant 0 : index
      %49 = vector.load %arg13[%c0_35, %c0_36] : memref<256x128xbf16, #tpu.memory_space<vmem>>, vector<256x128xbf16>
      %cst_37 = arith.constant dense<0.000000e+00> : vector<8x128xf32>
      %50 = tpu.matmul %48, %49, %cst_37 {dimension_numbers = #tpu.dot_dimension_numbers<[1], [0], [0], [1], [0, 0, 1, 1], [], []>} : vector<8x256xbf16>, vector<256x128xbf16>, vector<8x128xf32> -> vector<8x128xf32>
      %c0_38 = arith.constant 0 : index
      %c0_39 = arith.constant 0 : index
      %51 = vector.load %arg14[%c0_38, %c0_39] : memref<1x128xf32, #tpu.memory_space<vmem>>, vector<1x128xf32>
      %52 = vector.broadcast %51 : vector<1x128xf32> to vector<8x128xf32>
      %53 = arith.addf %50, %52 : vector<8x128xf32>
      %c0_40 = arith.constant 0 : index
      %c0_41 = arith.constant 0 : index
      %54 = vector.load %arg16[%c0_40, %c0_41] : memref<8x128xf32, #tpu.memory_space<vmem>>, vector<8x128xf32>
      tpu.vector_store %arg16[%c0_40, %c0_41], %53 {strides = array<i32>} : memref<8x128xf32, #tpu.memory_space<vmem>>, vector<8x128xf32>,
    } else {
    }
    %c0 = arith.constant 0 : index
    %c0_1 = arith.constant 0 : index
    %3 = vector.load %arg17[%c0, %c0_1] : memref<8x256xbf16, #tpu.memory_space<vmem>>, vector<8x256xbf16>
    %c0_2 = arith.constant 0 : index
    %c0_3 = arith.constant 0 : index
    %4 = vector.load %arg11[%c0_2, %c0_3] : memref<256x128xbf16, #tpu.memory_space<vmem>>, vector<256x128xbf16>
    %cst = arith.constant dense<0.000000e+00> : vector<8x128xf32>
    %5 = tpu.matmul %3, %4, %cst {dimension_numbers = #tpu.dot_dimension_numbers<[1], [0], [0], [1], [0, 0, 1, 1], [], []>} : vector<8x256xbf16>, vector<256x128xbf16>, vector<8x128xf32> -> vector<8x128xf32>
    %c0_4 = arith.constant 0 : index
    %c0_5 = arith.constant 0 : index
    %6 = vector.load %arg12[%c0_4, %c0_5] : memref<1x128xf32, #tpu.memory_space<vmem>>, vector<1x128xf32>
    %7 = vector.broadcast %6 : vector<1x128xf32> to vector<8x128xf32>
    %8 = arith.addf %5, %7 : vector<8x128xf32>
    %c0_6 = arith.constant 0 : index
    %c0_7 = arith.constant 0 : index
    %9 = vector.load %arg15[%c0_6, %c0_7] : memref<8x128xf32, #tpu.memory_space<vmem>>, vector<8x128xf32>
    tpu.vector_store %arg15[%c0_6, %c0_7], %8 {strides = array<i32>} : memref<8x128xf32, #tpu.memory_space<vmem>>, vector<8x128xf32>,
    return
  }
  func.func @transform_0(%arg0: i32, %arg1: i32) -> (i32, i32) {
    %c0_i32 = arith.constant 0 : i32
    %c0_i32_0 = arith.constant 0 : i32
    return %arg0, %c0_i32 : i32, i32
  }
  func.func @transform_1(%arg0: i32, %arg1: i32) -> (i32, i32) {
    %c0_i32 = arith.constant 0 : i32
    %c0_i32_0 = arith.constant 0 : i32
    return %arg0, %c0_i32 : i32, i32
  }
  func.func @transform_2(%arg0: i32, %arg1: i32) -> (i32, i32) {
    %c0_i32 = arith.constant 0 : i32
    %c0_i32_0 = arith.constant 0 : i32
    %c0_i32_1 = arith.constant 0 : i32
    return %c0_i32, %c0_i32_0 : i32, i32
  }
  func.func @transform_3(%arg0: i32, %arg1: i32) -> (i32, i32) {
    %c0_i32 = arith.constant 0 : i32
    %c0_i32_0 = arith.constant 0 : i32
    %c0_i32_1 = arith.constant 0 : i32
    return %c0_i32, %c0_i32_0 : i32, i32
  }
  func.func @transform_4(%arg0: i32, %arg1: i32) -> (i32, i32) {
    %c0_i32 = arith.constant 0 : i32
    %c0_i32_0 = arith.constant 0 : i32
    %c0_i32_1 = arith.constant 0 : i32
    return %c0_i32, %c0_i32_0 : i32, i32
  }
  func.func @transform_5(%arg0: i32, %arg1: i32) -> (i32, i32) {
    %c0_i32 = arith.constant 0 : i32
    %c0_i32_0 = arith.constant 0 : i32
    %c0_i32_1 = arith.constant 0 : i32
    return %c0_i32, %c0_i32_0 : i32, i32
  }
  func.func @transform_6(%arg0: i32, %arg1: i32) -> (i32, i32) {
    %c0_i32 = arith.constant 0 : i32
    %c0_i32_0 = arith.constant 0 : i32
    %c0_i32_1 = arith.constant 0 : i32
    return %c0_i32, %c0_i32_0 : i32, i32
  }
  func.func @transform_7(%arg0: i32, %arg1: i32) -> (i32, i32) {
    %c0_i32 = arith.constant 0 : i32
    %c0_i32_0 = arith.constant 0 : i32
    %c0_i32_1 = arith.constant 0 : i32
    return %c0_i32, %c0_i32_0 : i32, i32
  }
  func.func @transform_8(%arg0: i32, %arg1: i32) -> (i32, i32) {
    %c0_i32 = arith.constant 0 : i32
    %c0_i32_0 = arith.constant 0 : i32
    %c0_i32_1 = arith.constant 0 : i32
    return %c0_i32, %c0_i32_0 : i32, i32
  }
  func.func @transform_9(%arg0: i32, %arg1: i32) -> (i32, i32) {
    %c0_i32 = arith.constant 0 : i32
    %c0_i32_0 = arith.constant 0 : i32
    return %c0_i32, %arg1 : i32, i32
  }
  func.func @transform_10(%arg0: i32, %arg1: i32) -> (i32, i32) {
    %c0_i32 = arith.constant 0 : i32
    %c0_i32_0 = arith.constant 0 : i32
    return %c0_i32, %arg1 : i32, i32
  }
  func.func @transform_11(%arg0: i32, %arg1: i32) -> (i32, i32) {
    %c0_i32 = arith.constant 0 : i32
    %c0_i32_0 = arith.constant 0 : i32
    %c0_i32_1 = arith.constant 0 : i32
    return %c0_i32, %c0_i32_0 : i32, i32
  }
  func.func @transform_12(%arg0: i32, %arg1: i32) -> (i32, i32) {
    %c0_i32 = arith.constant 0 : i32
    %c0_i32_0 = arith.constant 0 : i32
    %c0_i32_1 = arith.constant 0 : i32
    return %c0_i32, %c0_i32_0 : i32, i32
  }
  func.func @transform_13(%arg0: i32, %arg1: i32) -> (i32, i32) {
    %c0_i32 = arith.constant 0 : i32
    return %arg0, %arg1 : i32, i32
  }
  func.func @transform_14(%arg0: i32, %arg1: i32) -> (i32, i32) {
    %c0_i32 = arith.constant 0 : i32
    %c0_i32_0 = arith.constant 0 : i32
    return %arg0, %c0_i32 : i32, i32
  }
}

</mosaic_0001>

<bundles_post_ra>
// kernel: discrete_transition_forward.1
= control target key start
LH: loop header
LB: loop body
LE: loop exit
PB: predicated region body
PF: predicated region fallthrough
CT: control target
= control target key end

     0   :  { %20 = vsyncpa [#allocation4], 0  ;;  %s2440_s0 = inlined_call_operand.vmem [shape: bf16[8,32], index: 0, kind: input, shape index: {}]   ;;  %s2441_s1 = inlined_call_operand.vmem [shape: s32[8,1], index: 1, kind: input, shape index: {}]   ;;  %s2442_s2 = inlined_call_operand.hbm [shape: bf16[32,256], index: 2, kind: input, shape index: {}]   ;;  %s2443_s3 = inlined_call_operand.vmem [shape: bf16[8,256], index: 3, kind: input, shape index: {}]   ;;  %s2444_s4 = inlined_call_operand.vmem [shape: f32[1,256], index: 4, kind: input, shape index: {}]   ;;  %s2445_s5 = inlined_call_operand.vmem [shape: bf16[256,256], index: 5, kind: input, shape index: {}]   ;;  %s2446_s6 = inlined_call_operand.vmem [shape: f32[1,256], index: 6, kind: input, shape index: {}]   ;;  %s2447_s7 = inlined_call_operand.hbm [shape: bf16[256,512], index: 7, kind: input, shape index: {}]   ;;  %s2448_s8 = inlined_call_operand.vmem [shape: f32[1,512], index: 8, kind: input, shape index: {}]   ;;  %s2449_s9 = inlined_call_operand.hbm [shape: bf16[256,128], index: 9, kind: input, shape index: {}]   ;;  %s2450_s10 = inlined_call_operand.vmem [shape: f32[1,128], index: 10, kind: input, shape index: {}]   ;;  %s2451_s11 = inlined_call_operand.hbm [shape: bf16[256,128], index: 11, kind: input, shape index: {}]   ;;  %s2452_s12 = inlined_call_operand.vmem [shape: f32[1,128], index: 12, kind: input, shape index: {}]   ;;  %s2453_s13 = inlined_call_operand.vmem [shape: f32[8,128], index: 13, kind: output, shape index: {0}]   ;;  %s2454_s14 = inlined_call_operand.vmem [shape: f32[8,128], index: 14, kind: output, shape index: {1}]  }
   0x1   :  { %21 = vsyncpa [#allocation6], 0  ;;  %s52_s15 = sshll.u32 %s2447_s7, 4  ;;  %s53_s15 = int_to_ptr.hbm [resolvable:$true] %s52_s15 }
   0x2   :  { %22 = vsyncpa [#allocation9], 0  ;;  %s2113_s16 = smov [#allocation5]   ;;  %s31_s20 = sshll.u32 %s2442_s2, 4  ;;  %s32_s20 = int_to_ptr.hbm [resolvable:$true] %s31_s20 }
   0x3   :  { %s54_s17 = sshll.u32 %s2113_s16, 4  ;;  %s2114_s21 = smov 256   ;;  %s55_s17 = int_to_ptr.vmem [resolvable:$true] %s54_s17 }
   0x4   :  { %s2115_s22 = smov 16   ;;  %s2116_s23 = smov [#allocation3]  }
   0x5   :  { %60 = dma.hbm_to_vmem [thread:$0]  %s53_s15, 8192, %s55_s17, [#allocation6], %s2114_s21, %s2114_s21, %s2115_s22  }
   0x6   :  { %s33_s24 = sshll.u32 %s2116_s23, 4  ;;  %s2117_s25 = smov 128   ;;  %s34_s24 = int_to_ptr.vmem [resolvable:$true] %s33_s24 }
   0x7   :  { %s2118_s26 = smov 8   ;;  %s67_s28 = sshll.u32 %s2449_s9, 4  ;;  %s68_s28 = int_to_ptr.hbm [resolvable:$true] %s67_s28 }
   0x8   :  { %39 = dma.hbm_to_vmem [thread:$0]  %s32_s20, 512, %s34_s24, [#allocation4], %s2117_s25, %s2117_s25, %s2118_s26  }
   0x9   :  { %s2119_s29 = smov [#allocation7]   ;;  %s82_s18 = sshll.u32 %s2451_s11, 4  ;;  %s83_s18 = int_to_ptr.hbm [resolvable:$true] %s82_s18 }
   0xa   :  { %s69_s30 = sshll.u32 %s2119_s29, 4  ;;  %s2120_s15 = smov 64   ;;  %s70_s30 = int_to_ptr.vmem [resolvable:$true] %s69_s30 }
   0xb   :  { %s2121_s17 = smov 4   ;;  %s2122_s19 = smov [#allocation8]  }
   0xc   :  { %75 = dma.hbm_to_vmem [thread:$0]  %s68_s28, 2048, %s70_s30, [#allocation6], %s2120_s15, %s2120_s15, %s2121_s17  }
   0xd   :  { %s84_s21 = sshll.u32 %s2122_s19, 4  ;;  %s85_s21 = int_to_ptr.vmem [resolvable:$true] %s84_s21 }
   0xe   :  { %90 = dma.hbm_to_vmem [thread:$0]  %s83_s18, 2048, %s85_s21, [#allocation9], %s2120_s15, %s2120_s15, %s2121_s17  }
   0xf   :  { %2107 = dma.done.wait [#allocation4], 512  }
  0x10   :  { %2108 = vsyncadd [#allocation4], 4294966784 }
  0x11   :  { %2109 = dma.done.wait [#allocation6], 10240  }
  0x12   :  { %2110 = vsyncadd [#allocation6], 4294957056 }
  0x13   :  { %2111 = dma.done.wait [#allocation9], 2048  }
  0x14   :  { %2112 = vsyncadd [#allocation9], 4294965248  ;;  %v2123_v0 = vmov 0   ;;  %v116_v1 = vld [vmem:[%s2441_s1] sm:$0xff]  ;;  %v1344_v2 = vld [vmem:[#allocation3 + $0x10] sm:$0xf] }
  0x15   :  { %2008 = vset.pattern.permute.xlu0 %v2123_v0  ;;  %v1867_v3 = vld [vmem:[#allocation3 + $0x14] sm:$0xf0]  ;;  %v1866_v5 = vld [vmem:[#allocation3 + $0x14] sm:$0xf]  ;;  %v1346_v6 = vld [vmem:[#allocation3 + $0x18] sm:$0xf0] }
  0x16   :  { %118 = vperm.xlu0 %2008, %v116_v1   ;;  %v1345_v4 = vor.u32 %v1867_v3, %v1344_v2  ;;  %v1336_v7 = vld [vmem:[#allocation3] sm:$0xf]  ;;  %v1349_v8 = vor.u32 %v1866_v5, %v1346_v6  ;;  %v1865_v9 = vld [vmem:[#allocation3 + $0x4] sm:$0xf0]  ;;  %v1864_v10 = vld [vmem:[#allocation3 + $0x4] sm:$0xf]  ;;  %v114_v6 = vlaneseq }
  0x17   :  { %v1338_v11 = vld [vmem:[#allocation3 + $0x8] sm:$0xf0]  ;;  %v1337_v12 = vor.u32 %v1865_v9, %v1336_v7  ;;  %v124_v14 = vld [vmem:[%s2440_s0] sm:$0xf]  ;;  %vm192_vm0 = vcmask 261120   ;;  %vm139_vm1 = vcmask 1043456  }
  0x18   :  { %202 = vmatpush.bf16.msra.mxu2 %v1345_v4  ;;  %215 = vmatpush.bf16.msra.mxu3 %v1349_v8  ;;  %v1341_v13 = vor.u32 %v1864_v10, %v1338_v11  ;;  %v129_v15 = vld [vmem:[%s2443_s3] sm:$0xff]  ;;  %v1410_v22 = vld [vmem:[%s2445_s5 + $0x70] sm:$0xf]  ;;  %v1883_v23 = vld [vmem:[%s2445_s5 + $0x74] sm:$0xf0]  ;;  %v115_v7 = vand.u32 127, %v114_v6 }
  0x19   :  { %v131_v16 = vunpack.c.l.b16 %v129_v15  ;;  %v132_v17 = vunpack.c.h.b16 %v129_v15  ;;  %v1474_v24 = vld [vmem:[%s2445_s5 + $0xf0] sm:$0xf]  ;;  %v1411_v25 = vor.u32 %v1883_v23, %v1410_v22  ;;  %v1899_v26 = vld [vmem:[%s2445_s5 + $0xf4] sm:$0xf0]  ;;  %v1882_v27 = vld [vmem:[%s2445_s5 + $0x74] sm:$0xf] }
  0x1a   :  { %v1412_v28 = vld [vmem:[%s2445_s5 + $0x78] sm:$0xf0]  ;;  %v1475_v29 = vor.u32 %v1899_v26, %v1474_v24  ;;  %v1898_v31 = vld [vmem:[%s2445_s5 + $0xf4] sm:$0xf]  ;;  %v1402_v33 = vld [vmem:[%s2445_s5 + $0x60] sm:$0xf] }
  0x1b   :  { %v133_v18 = vpack.c.b16 %v131_v16, %v131_v16  ;;  %v134_v19 = vpack.c.b16 %v132_v17, %v132_v17  ;;  %v1415_v30 = vor.u32 %v1882_v27, %v1412_v28  ;;  %v1476_v32 = vld [vmem:[%s2445_s5 + $0xf8] sm:$0xf0]  ;;  %v1881_v35 = vld [vmem:[%s2445_s5 + $0x64] sm:$0xf0]  ;;  %v1466_v36 = vld [vmem:[%s2445_s5 + $0xe0] sm:$0xf] }
  0x1c   :  { %203 = vmatpush.bf16.msra.mxu2 %v1337_v12  ;;  %216 = vmatpush.bf16.msra.mxu3 %v1341_v13  ;;  %v1479_v34 = vor.u32 %v1898_v31, %v1476_v32  ;;  %v1897_v37 = vld [vmem:[%s2445_s5 + $0xe4] sm:$0xf0]  ;;  %v1403_v38 = vor.u32 %v1881_v35, %v1402_v33  ;;  %v1880_v40 = vld [vmem:[%s2445_s5 + $0x64] sm:$0xf]  ;;  %v1404_v41 = vld [vmem:[%s2445_s5 + $0x68] sm:$0xf0] }
  0x1d   :  { %v141_v20 = vsel %vm139_vm1, %v133_v18, 0  ;;  %v144_v21 = vsel %vm139_vm1, %v134_v19, 0  ;;  %v1467_v39 = vor.u32 %v1897_v37, %v1466_v36  ;;  %v1896_v42 = vld [vmem:[%s2445_s5 + $0xe4] sm:$0xf]  ;;  %v1407_v43 = vor.u32 %v1880_v40, %v1404_v41  ;;  %v1468_v44 = vld [vmem:[%s2445_s5 + $0xe8] sm:$0xf0] }
  0x1e   :  { %153 = vmatpush.bf16.msra.mxu0 %v141_v20  ;;  %166 = vmatpush.bf16.msra.mxu1 %v144_v21  ;;  %v1394_v45 = vld [vmem:[%s2445_s5 + $0x50] sm:$0xf]  ;;  %v1879_v46 = vld [vmem:[%s2445_s5 + $0x54] sm:$0xf0]  ;;  %v1471_v47 = vor.u32 %v1896_v42, %v1468_v44  ;;  %v1878_v50 = vld [vmem:[%s2445_s5 + $0x54] sm:$0xf] }
  0x1f   :  { %1350 = vmatmul.msk.bf16.vlgmr.msra.gmra.mxu2 %vm192_vm0, %v124_v14  ;;  %1351 = vmatmul.msk.bf16.vlgmr.msra.gmra.mxu3 %vm192_vm0, %v124_v14  ;;  %v1458_v48 = vld [vmem:[%s2445_s5 + $0xd0] sm:$0xf]  ;;  %v1895_v49 = vld [vmem:[%s2445_s5 + $0xd4] sm:$0xf0]  ;;  %v1395_v51 = vor.u32 %v1879_v46, %v1394_v45  ;;  %v1396_v52 = vld [vmem:[%s2445_s5 + $0x58] sm:$0xf0] }
  0x20   :  { %458 = vmatpush.bf16.msrb.mxu2 %v1415_v30  ;;  %471 = vmatpush.bf16.msrb.mxu3 %v1479_v34  ;;  %v1894_v53 = vld [vmem:[%s2445_s5 + $0xd4] sm:$0xf]  ;;  %v1460_v54 = vld [vmem:[%s2445_s5 + $0xd8] sm:$0xf0]  ;;  %v1459_v55 = vor.u32 %v1895_v49, %v1458_v48  ;;  %v1399_v56 = vor.u32 %v1878_v50, %v1396_v52  ;;  %v1386_v57 = vld [vmem:[%s2445_s5 + $0x40] sm:$0xf] }
  0x21   :  { %v1877_v58 = vld [vmem:[%s2445_s5 + $0x44] sm:$0xf0]  ;;  %v1450_v59 = vld [vmem:[%s2445_s5 + $0xc0] sm:$0xf]  ;;  %v1463_v60 = vor.u32 %v1894_v53, %v1460_v54  ;;  %v1876_v62 = vld [vmem:[%s2445_s5 + $0x44] sm:$0xf] }
  0x22   :  { %432 = vmatpush.bf16.msrb.mxu0 %v1411_v25  ;;  %445 = vmatpush.bf16.msrb.mxu1 %v1475_v29  ;;  %v1893_v61 = vld [vmem:[%s2445_s5 + $0xc4] sm:$0xf0]  ;;  %v1388_v63 = vld [vmem:[%s2445_s5 + $0x48] sm:$0xf0]  ;;  %v1892_v0 = vld [vmem:[%s2445_s5 + $0xc4] sm:$0xf]  ;;  %v1387_v2 = vor.u32 %v1877_v58, %v1386_v57 }
  0x23   :  { %v1452_v1 = vld [vmem:[%s2445_s5 + $0xc8] sm:$0xf0]  ;;  %v1451_v3 = vor.u32 %v1893_v61, %v1450_v59  ;;  %v1391_v4 = vor.u32 %v1876_v62, %v1388_v63  ;;  %v1378_v8 = vld [vmem:[%s2445_s5 + $0x30] sm:$0xf]  ;;  %v1875_v9 = vld [vmem:[%s2445_s5 + $0x34] sm:$0xf0] }
  0x24   :  { %459 = vmatpush.bf16.msrb.mxu2 %v1407_v43  ;;  %472 = vmatpush.bf16.msrb.mxu3 %v1471_v47  ;;  %v1455_v5 = vor.u32 %v1892_v0, %v1452_v1  ;;  %v1442_v10 = vld [vmem:[%s2445_s5 + $0xb0] sm:$0xf]  ;;  %v1379_v11 = vor.u32 %v1875_v9, %v1378_v8  ;;  %v1891_v12 = vld [vmem:[%s2445_s5 + $0xb4] sm:$0xf0]  ;;  %v1874_v13 = vld [vmem:[%s2445_s5 + $0x34] sm:$0xf] }
  0x25   :  { %v1380_v14 = vld [vmem:[%s2445_s5 + $0x38] sm:$0xf0]  ;;  %v1443_v15 = vor.u32 %v1891_v12, %v1442_v10  ;;  %v1890_v17 = vld [vmem:[%s2445_s5 + $0xb4] sm:$0xf]  ;;  %v1370_v19 = vld [vmem:[%s2445_s5 + $0x20] sm:$0xf] }
  0x26   :  { %433 = vmatpush.bf16.msrb.mxu0 %v1403_v38  ;;  %446 = vmatpush.bf16.msrb.mxu1 %v1467_v39  ;;  %v1383_v16 = vor.u32 %v1874_v13, %v1380_v14  ;;  %v1444_v18 = vld [vmem:[%s2445_s5 + $0xb8] sm:$0xf0]  ;;  %v1873_v21 = vld [vmem:[%s2445_s5 + $0x24] sm:$0xf0]  ;;  %v1434_v22 = vld [vmem:[%s2445_s5 + $0xa0] sm:$0xf] }
  0x27   :  { %v1447_v20 = vor.u32 %v1890_v17, %v1444_v18  ;;  %v1889_v23 = vld [vmem:[%s2445_s5 + $0xa4] sm:$0xf0]  ;;  %v1371_v24 = vor.u32 %v1873_v21, %v1370_v19  ;;  %v1872_v26 = vld [vmem:[%s2445_s5 + $0x24] sm:$0xf]  ;;  %v1372_v27 = vld [vmem:[%s2445_s5 + $0x28] sm:$0xf0] }
  0x28   :  { %460 = vmatpush.bf16.msrb.mxu2 %v1399_v56  ;;  %473 = vmatpush.bf16.msrb.mxu3 %v1463_v60  ;;  %v1435_v25 = vor.u32 %v1889_v23, %v1434_v22  ;;  %v1888_v28 = vld [vmem:[%s2445_s5 + $0xa4] sm:$0xf]  ;;  %v1375_v30 = vor.u32 %v1872_v26, %v1372_v27  ;;  %v1436_v31 = vld [vmem:[%s2445_s5 + $0xa8] sm:$0xf0]  ;;  %v2124_v33 = vmov 0.0   ;;  %vm135_vm3 = vcmask 64512  }
  0x29   :  { %v1439_v32 = vor.u32 %v1888_v28, %v1436_v31  ;;  %v1362_v40 = vld [vmem:[%s2445_s5 + $0x10] sm:$0xf]  ;;  %v1871_v41 = vld [vmem:[%s2445_s5 + $0x14] sm:$0xf0]  ;;  %v1870_v45 = vld [vmem:[%s2445_s5 + $0x14] sm:$0xf] }
  0x2a   :  { %434 = vmatpush.bf16.msrb.mxu0 %v1395_v51  ;;  %447 = vmatpush.bf16.msrb.mxu1 %v1459_v55  ;;  %v1426_v42 = vld [vmem:[%s2445_s5 + $0x90] sm:$0xf]  ;;  %v1363_v43 = vor.u32 %v1871_v41, %v1362_v40  ;;  %v1887_v44 = vld [vmem:[%s2445_s5 + $0x94] sm:$0xf0]  ;;  %v1364_v47 = vld [vmem:[%s2445_s5 + $0x18] sm:$0xf0] }
  0x2b   :  { %v1427_v46 = vor.u32 %v1887_v44, %v1426_v42  ;;  %v1886_v48 = vld [vmem:[%s2445_s5 + $0x94] sm:$0xf]  ;;  %v1367_v49 = vor.u32 %v1870_v45, %v1364_v47  ;;  %v1428_v50 = vld [vmem:[%s2445_s5 + $0x98] sm:$0xf0]  ;;  %v1354_v52 = vld [vmem:[%s2445_s5] sm:$0xf] }
  0x2c   :  { %461 = vmatpush.bf16.msrb.mxu2 %v1391_v4  ;;  %474 = vmatpush.bf16.msrb.mxu3 %v1455_v5  ;;  %v1431_v51 = vor.u32 %v1886_v48, %v1428_v50  ;;  %v1869_v53 = vld [vmem:[%s2445_s5 + $0x4] sm:$0xf0]  ;;  %v1418_v54 = vld [vmem:[%s2445_s5 + $0x80] sm:$0xf]  ;;  %v1868_v57 = vld [vmem:[%s2445_s5 + $0x4] sm:$0xf] }
  0x2d   :  { %v1355_v55 = vor.u32 %v1869_v53, %v1354_v52  ;;  %v1885_v56 = vld [vmem:[%s2445_s5 + $0x84] sm:$0xf0]  ;;  %v1356_v58 = vld [vmem:[%s2445_s5 + $0x8] sm:$0xf0]  ;;  %v1884_v61 = vld [vmem:[%s2445_s5 + $0x84] sm:$0xf] }
  0x2e   :  { %435 = vmatpush.bf16.msrb.mxu0 %v1387_v2  ;;  %448 = vmatpush.bf16.msrb.mxu1 %v1451_v3  ;;  %v1419_v59 = vor.u32 %v1885_v56, %v1418_v54  ;;  %v1359_v60 = vor.u32 %v1868_v57, %v1356_v58  ;;  %v1420_v62 = vld [vmem:[%s2445_s5 + $0x88] sm:$0xf0]  ;;  %v1594_v0 = vld [vmem:[#allocation5 + $0xe0] sm:$0xf]  ;;  %v1930_v1 = vld [vmem:[#allocation5 + $0xec] sm:$0xf0] }
  0x2f   :  { %v1423_v63 = vor.u32 %v1884_v61, %v1420_v62  ;;  %v1928_v2 = vld [vmem:[#allocation5 + $0xe4] sm:$0xf]  ;;  %v1595_v3 = vor.u32 %v1930_v1, %v1594_v0  ;;  %v1596_v4 = vld [vmem:[#allocation5 + $0xf0] sm:$0xf0]  ;;  %v1578_v5 = vld [vmem:[#allocation5 + $0xc0] sm:$0xf] }
  0x30   :  { %462 = vmatpush.bf16.msrb.mxu2 %v1383_v16  ;;  %475 = vmatpush.bf16.msrb.mxu3 %v1447_v20  ;;  %v1926_v6 = vld [vmem:[#allocation5 + $0xcc] sm:$0xf0]  ;;  %v1924_v8 = vld [vmem:[#allocation5 + $0xc4] sm:$0xf]  ;;  %v1580_v9 = vld [vmem:[#allocation5 + $0xd0] sm:$0xf0] }
  0x31   :  { %v1722_v10 = vld [vmem:[#allocation5 + $0x1e0] sm:$0xf]  ;;  %v1962_v12 = vld [vmem:[#allocation5 + $0x1ec] sm:$0xf0]  ;;  %v1960_v13 = vld [vmem:[#allocation5 + $0x1e4] sm:$0xf] }
  0x32   :  { %436 = vmatpush.bf16.msrb.mxu0 %v1379_v11  ;;  %449 = vmatpush.bf16.msrb.mxu1 %v1443_v15  ;;  %v1579_v11 = vor.u32 %v1926_v6, %v1578_v5  ;;  %v1724_v14 = vld [vmem:[#allocation5 + $0x1f0] sm:$0xf0]  ;;  %v1583_v15 = vor.u32 %v1924_v8, %v1580_v9  ;;  %v1723_v16 = vor.u32 %v1962_v12, %v1722_v10  ;;  %v1562_v18 = vld [vmem:[#allocation5 + $0xa0] sm:$0xf]  ;;  %v1922_v19 = vld [vmem:[#allocation5 + $0xac] sm:$0xf0] }
  0x33   :  { %v1727_v17 = vor.u32 %v1960_v13, %v1724_v14  ;;  %v1920_v20 = vld [vmem:[#allocation5 + $0xa4] sm:$0xf]  ;;  %v1564_v21 = vld [vmem:[#allocation5 + $0xb0] sm:$0xf0]  ;;  %v1706_v22 = vld [vmem:[#allocation5 + $0x1c0] sm:$0xf]  ;;  %v1563_v27 = vor.u32 %v1922_v19, %v1562_v18 }
  0x34   :  { %463 = vmatpush.bf16.msrb.mxu2 %v1375_v30  ;;  %476 = vmatpush.bf16.msrb.mxu3 %v1439_v32  ;;  %v1958_v23 = vld [vmem:[#allocation5 + $0x1cc] sm:$0xf0]  ;;  %v1708_v26 = vld [vmem:[#allocation5 + $0x1d0] sm:$0xf0]  ;;  %v1567_v31 = vor.u32 %v1920_v20, %v1564_v21  ;;  %v1690_v32 = vld [vmem:[#allocation5 + $0x1a0] sm:$0xf] }
  0x35   :  { %v1918_v30 = vld [vmem:[#allocation5 + $0x8c] sm:$0xf0]  ;;  %v1674_v42 = vld [vmem:[#allocation5 + $0x180] sm:$0xf]  ;;  %v1948_v45 = vld [vmem:[#allocation5 + $0x184] sm:$0xf] }
  0x36   :  { %437 = vmatpush.bf16.msrb.mxu0 %v1371_v24  ;;  %450 = vmatpush.bf16.msrb.mxu1 %v1435_v25  ;;  %v1707_v24 = vor.u32 %v1958_v23, %v1706_v22  ;;  %v1956_v25 = vld [vmem:[#allocation5 + $0x1c4] sm:$0xf]  ;;  %v1950_v44 = vld [vmem:[#allocation5 + $0x18c] sm:$0xf0]  ;;  %v1530_v48 = vld [vmem:[#allocation5 + $0x60] sm:$0xf] }
  0x37   :  { %v1711_v28 = vor.u32 %v1956_v25, %v1708_v26  ;;  %v1912_v50 = vld [vmem:[#allocation5 + $0x64] sm:$0xf]  ;;  %v1675_v52 = vor.u32 %v1950_v44, %v1674_v42  ;;  %v1658_v54 = vld [vmem:[#allocation5 + $0x160] sm:$0xf]  ;;  %v1946_v56 = vld [vmem:[#allocation5 + $0x16c] sm:$0xf0] }
  0x38   :  { %464 = vmatpush.bf16.msrb.mxu2 %v1367_v49  ;;  %477 = vmatpush.bf16.msrb.mxu3 %v1431_v51  ;;  %v1914_v49 = vld [vmem:[#allocation5 + $0x6c] sm:$0xf0]  ;;  %v1532_v51 = vld [vmem:[#allocation5 + $0x70] sm:$0xf0]  ;;  %v1944_v57 = vld [vmem:[#allocation5 + $0x164] sm:$0xf]  ;;  %v1659_v1 = vor.u32 %v1946_v56, %v1658_v54 }
  0x39   :  { %v1660_v58 = vld [vmem:[#allocation5 + $0x170] sm:$0xf0]  ;;  %v1910_v61 = vld [vmem:[#allocation5 + $0x4c] sm:$0xf0]  ;;  %v1908_v62 = vld [vmem:[#allocation5 + $0x44] sm:$0xf] }
  0x3a   :  { %438 = vmatpush.bf16.msrb.mxu0 %v1363_v43  ;;  %451 = vmatpush.bf16.msrb.mxu1 %v1427_v46  ;;  %v1676_v46 = vld [vmem:[#allocation5 + $0x190] sm:$0xf0]  ;;  %v222_v0 = vld [vmem:[%s2444_s4] sm:$0x3]  ;;  %v1942_v5 = vld [vmem:[#allocation5 + $0x14c] sm:$0xf0] }
  0x3b   :  { %v1679_v53 = vor.u32 %v1948_v45, %v1676_v46  ;;  %v1940_v6 = vld [vmem:[#allocation5 + $0x144] sm:$0xf]  ;;  %v1498_v9 = vld [vmem:[#allocation5 + $0x20] sm:$0xf]  ;;  %v1906_v10 = vld [vmem:[#allocation5 + $0x2c] sm:$0xf0] }
  0x3c   :  { %465 = vmatpush.bf16.msrb.mxu2 %v1359_v60  ;;  %478 = vmatpush.bf16.msrb.mxu3 %v1423_v63  ;;  %v1514_v60 = vld [vmem:[#allocation5 + $0x40] sm:$0xf]  ;;  %v1516_v63 = vld [vmem:[#allocation5 + $0x50] sm:$0xf0]  ;;  %v225_v12 = vperm.slane %v222_v0, 1  ;;  %v1499_v22 = vor.u32 %v1906_v10, %v1498_v9 }
  0x3d   :  { %v1519_v8 = vor.u32 %v1908_v62, %v1516_v63  ;;  %v1904_v13 = vld [vmem:[#allocation5 + $0x24] sm:$0xf]  ;;  %v1500_v14 = vld [vmem:[#allocation5 + $0x30] sm:$0xf0]  ;;  %v1626_v19 = vld [vmem:[#allocation5 + $0x120] sm:$0xf] }
  0x3e   :  { %439 = vmatpush.bf16.msrb.mxu0 %v1355_v55  ;;  %452 = vmatpush.bf16.msrb.mxu1 %v1419_v59  ;;  %v1531_v55 = vor.u32 %v1914_v49, %v1530_v48  ;;  %v1535_v59 = vor.u32 %v1912_v50, %v1532_v51  ;;  %v1938_v23 = vld [vmem:[#allocation5 + $0x12c] sm:$0xf0]  ;;  %v1628_v25 = vld [vmem:[#allocation5 + $0x130] sm:$0xf0]  ;;  %v1503_v26 = vor.u32 %v1904_v13, %v1500_v14  ;;  %v1927_v54 = vld [vmem:[#allocation5 + $0xd4] sm:$0xf0] }
  0x3f   :  { %v1934_v42 = vld [vmem:[#allocation5 + $0x10c] sm:$0xf0]  ;;  %v1612_v44 = vld [vmem:[#allocation5 + $0x110] sm:$0xf0]  ;;  %v1588_v56 = vld [vmem:[#allocation5 + $0xd8] sm:$0xf0] }
  0x40   :  { %921 = vmatpush.bf16.msra.mxu3 %v1727_v17  ;;  %v1963_v62 = vld [vmem:[#allocation5 + $0x1f4] sm:$0xf0]  ;;  %v1961_v63 = vld [vmem:[#allocation5 + $0x1ec] sm:$0xf]  ;;  %v1714_v9 = vld [vmem:[#allocation5 + $0x1c8] sm:$0xf] }
  0x41   :  { %v1959_v10 = vld [vmem:[#allocation5 + $0x1d4] sm:$0xf0]  ;;  %v1716_v13 = vld [vmem:[#allocation5 + $0x1d8] sm:$0xf0] }
  0x44   :  { %922 = vmatpush.bf16.msra.mxu3 %v1711_v28 }
  0x88   :  { %v119_v29 = vpop.permute.xlu0 %118 }
  0x89   :  { %vm120_vm2 = vcmp.eq.s32.totalorder %v115_v7, %v119_v29  ;;  %v1599_v7 = vor.u32 %v1928_v2, %v1596_v4  ;;  %v1546_v29 = vld [vmem:[#allocation5 + $0x80] sm:$0xf]  ;;  %v1663_v2 = vor.u32 %v1944_v57, %v1660_v58  ;;  %v1515_v4 = vor.u32 %v1910_v61, %v1514_v60  ;;  %v1730_v61 = vld [vmem:[#allocation5 + $0x1e8] sm:$0xf] }
  0x8a   :  { %v1331_v34 = vsel %vm120_vm2, 1.0, %v2124_v33  ;;  %v1954_v33 = vld [vmem:[#allocation5 + $0x1ac] sm:$0xf0]  ;;  %v1547_v43 = vor.u32 %v1918_v30, %v1546_v29 }
  0x8b   :  { %v123_v35 = vpack.c.bf16 %v1331_v34, %v1331_v34  ;;  %908 = vmatpush.bf16.msra.mxu2 %v1599_v7  ;;  %v1952_v34 = vld [vmem:[#allocation5 + $0x1a4] sm:$0xf]  ;;  %v1691_v40 = vor.u32 %v1954_v33, %v1690_v32  ;;  %v1644_v7 = vld [vmem:[#allocation5 + $0x150] sm:$0xf0]  ;;  %v1902_v30 = vld [vmem:[#allocation5 + $0xc] sm:$0xf0] }
  0x8c   :  { %v1647_v18 = vor.u32 %v1940_v6, %v1644_v7  ;;  %v1484_v32 = vld [vmem:[#allocation5 + $0x10] sm:$0xf0]  ;;  %v1602_v33 = vld [vmem:[#allocation5 + $0xe8] sm:$0xf]  ;;  %v1572_v7 = vld [vmem:[#allocation5 + $0xb8] sm:$0xf0] }
  0x8d   :  { %1332 = vmatmul.msk.bf16.vlgmr.msra.gmra.mxu0 %vm135_vm3, %v123_v35  ;;  %1333 = vmatmul.msk.bf16.vlgmr.msra.gmra.mxu1 %vm135_vm3, %v123_v35  ;;  %v1916_v35 = vld [vmem:[#allocation5 + $0x84] sm:$0xf] }
  0x8e   :  { %882 = vmatpush.bf16.msra.mxu0 %v1595_v3  ;;  %895 = vmatpush.bf16.msra.mxu1 %v1723_v16  ;;  %v1642_v3 = vld [vmem:[#allocation5 + $0x140] sm:$0xf] }
  0x8f   :  { %909 = vmatpush.bf16.msra.mxu2 %v1583_v15  ;;  %v1643_v17 = vor.u32 %v1942_v5, %v1642_v3  ;;  %v1570_v3 = vld [vmem:[#allocation5 + $0xa8] sm:$0xf]  ;;  %v1921_v5 = vld [vmem:[#allocation5 + $0xac] sm:$0xf] }
  0x92   :  { %883 = vmatpush.bf16.msra.mxu0 %v1579_v11  ;;  %896 = vmatpush.bf16.msra.mxu1 %v1707_v24  ;;  %v224_v11 = vperm.slane %v222_v0, 0  ;;  %v1936_v24 = vld [vmem:[#allocation5 + $0x124] sm:$0xf]  ;;  %v1731_v0 = vor.u32 %v1963_v62, %v1730_v61  ;;  %v1652_v61 = vld [vmem:[#allocation5 + $0x158] sm:$0xf0] }
  0x93   :  { %910 = vmatpush.bf16.msra.mxu2 %v1567_v31  ;;  %v1900_v31 = vld [vmem:[#allocation5 + $0x4] sm:$0xf]  ;;  %v1490_v62 = vld [vmem:[#allocation5 + $0x8] sm:$0xf] }
  0x94   :  { %v1487_v48 = vor.u32 %v1900_v31, %v1484_v32  ;;  %v1540_v31 = vld [vmem:[#allocation5 + $0x78] sm:$0xf0] }
  0x96   :  { %884 = vmatpush.bf16.msra.mxu0 %v1563_v27  ;;  %897 = vmatpush.bf16.msra.mxu1 %v1691_v40  ;;  %v1482_v27 = vld [vmem:[#allocation5] sm:$0xf]  ;;  %v1604_v40 = vld [vmem:[#allocation5 + $0xf8] sm:$0xf0] }
  0x9a   :  { %885 = vmatpush.bf16.msra.mxu0 %v1547_v43  ;;  %898 = vmatpush.bf16.msra.mxu1 %v1675_v52  ;;  %v1932_v43 = vld [vmem:[#allocation5 + $0x104] sm:$0xf] }
  0x9b   :  { %v1615_v58 = vor.u32 %v1932_v43, %v1612_v44  ;;  %v1524_v43 = vld [vmem:[#allocation5 + $0x58] sm:$0xf0] }
  0x9e   :  { %886 = vmatpush.bf16.msra.mxu0 %v1531_v55  ;;  %899 = vmatpush.bf16.msra.mxu1 %v1659_v1  ;;  %v1925_v55 = vld [vmem:[#allocation5 + $0xcc] sm:$0xf]  ;;  %v1732_v1 = vld [vmem:[#allocation5 + $0x1f8] sm:$0xf0] }
  0x9f   :  { %v1591_v60 = vor.u32 %v1925_v55, %v1588_v56  ;;  %v1508_v55 = vld [vmem:[#allocation5 + $0x38] sm:$0xf0]  ;;  %v1650_v56 = vld [vmem:[#allocation5 + $0x148] sm:$0xf] }
  0xa2   :  { %v2365_v36 = vpop.f32.mrf.mxu2  ;;  %v2367_v37 = vpop.f32.mrf.mxu3  ;;  %887 = vmatpush.bf16.msra.mxu0 %v1515_v4  ;;  %900 = vmatpush.bf16.msra.mxu1 %v1643_v17  ;;  %v1923_v4 = vld [vmem:[#allocation5 + $0xb4] sm:$0xf0]  ;;  %v1917_v17 = vld [vmem:[#allocation5 + $0x8c] sm:$0xf] }
  0xa3   :  { %v1571_v6 = vor.u32 %v1923_v4, %v1570_v3 }
  0xa6   :  { %888 = vmatpush.bf16.msra.mxu0 %v1499_v22  ;;  %v1955_v22 = vld [vmem:[#allocation5 + $0x1b4] sm:$0xf0] }
  0xaa   :  { %v207_v38 = vpop.f32.mrf.mxu2  ;;  %v220_v39 = vpop.f32.mrf.mxu3 }
  0xab   :  { %v1548_v38 = vld [vmem:[#allocation5 + $0x90] sm:$0xf0] }
  0xac   :  { %v1692_v39 = vld [vmem:[#allocation5 + $0x1b0] sm:$0xf0]  ;;  %v1551_v47 = vor.u32 %v1916_v35, %v1548_v38  ;;  %v1627_v35 = vor.u32 %v1938_v23, %v1626_v19  ;;  %v1556_v19 = vld [vmem:[#allocation5 + $0x98] sm:$0xf0] }
  0xad   :  { %v1695_v41 = vor.u32 %v1952_v34, %v1692_v39  ;;  %v1931_v34 = vld [vmem:[#allocation5 + $0xf4] sm:$0xf0] }
  0xae   :  { %911 = vmatpush.bf16.msra.mxu2 %v1551_v47  ;;  %v1483_v47 = vor.u32 %v1902_v30, %v1482_v27  ;;  %v1603_v51 = vor.u32 %v1931_v34, %v1602_v33  ;;  %901 = vmatpush.bf16.msra.mxu1 %v1627_v35  ;;  %v1538_v27 = vld [vmem:[#allocation5 + $0x68] sm:$0xf]  ;;  %v1951_v34 = vld [vmem:[#allocation5 + $0x194] sm:$0xf0] }
  0xaf   :  { %923 = vmatpush.bf16.msra.mxu3 %v1695_v41  ;;  %v1610_v41 = vld [vmem:[#allocation5 + $0x100] sm:$0xf]  ;;  %v1682_v33 = vld [vmem:[#allocation5 + $0x188] sm:$0xf] }
  0xb0   :  { %v1611_v57 = vor.u32 %v1934_v42, %v1610_v41  ;;  %889 = vmatpush.bf16.msra.mxu0 %v1483_v47  ;;  %v1683_v35 = vor.u32 %v1951_v34, %v1682_v33  ;;  %v1909_v41 = vld [vmem:[#allocation5 + $0x4c] sm:$0xf]  ;;  %v1986_v34 = vld [vmem:[#allocation7 + $0x30] sm:$0xff] }
  0xb1   :  { %v1527_v44 = vor.u32 %v1909_v41, %v1524_v43  ;;  %v1945_v47 = vld [vmem:[#allocation5 + $0x16c] sm:$0xf]  ;;  %v1970_v43 = vld [vmem:[#allocation8 + $0x30] sm:$0xff] }
  0xb2   :  { %912 = vmatpush.bf16.msra.mxu2 %v1535_v59  ;;  %902 = vmatpush.bf16.msra.mxu1 %v1611_v57  ;;  %v1943_v57 = vld [vmem:[#allocation5 + $0x154] sm:$0xf0]  ;;  %v1985_v41 = vld [vmem:[#allocation7 + $0x28] sm:$0xff] }
  0xb3   :  { %924 = vmatpush.bf16.msra.mxu3 %v1679_v53  ;;  %v1586_v53 = vld [vmem:[#allocation5 + $0xc8] sm:$0xf] }
  0xb4   :  { %v1587_v59 = vor.u32 %v1927_v54, %v1586_v53  ;;  %v1905_v53 = vld [vmem:[#allocation5 + $0x2c] sm:$0xf] }
  0xb6   :  { %913 = vmatpush.bf16.msra.mxu2 %v1519_v8  ;;  %v1575_v8 = vor.u32 %v1921_v5, %v1572_v7  ;;  %v1634_v5 = vld [vmem:[#allocation5 + $0x128] sm:$0xf]  ;;  %v1937_v7 = vld [vmem:[#allocation5 + $0x12c] sm:$0xf] }
  0xb7   :  { %925 = vmatpush.bf16.msra.mxu3 %v1663_v2  ;;  %v1735_v2 = vor.u32 %v1961_v63, %v1732_v1  ;;  %v1901_v1 = vld [vmem:[#allocation5 + $0xc] sm:$0xf] }
  0xba   :  { %914 = vmatpush.bf16.msra.mxu2 %v1503_v26 }
  0xbb   :  { %926 = vmatpush.bf16.msra.mxu3 %v1647_v18 }
  0xbe   :  { %915 = vmatpush.bf16.msra.mxu2 %v1487_v48 }
 0x10a   :  { %v155_v15 = vpop.f32.mrf.mxu0  ;;  %v168_v16 = vpop.f32.mrf.mxu1 }
 0x10b   :  { %v206_v20 = vadd.f32 %v2365_v36, %v155_v15  ;;  %v219_v21 = vadd.f32 %v2367_v37, %v168_v16  ;;  %v1929_v36 = vld [vmem:[#allocation5 + $0xec] sm:$0xf]  ;;  %v1631_v37 = vor.u32 %v1936_v24, %v1628_v25  ;;  %v1554_v15 = vld [vmem:[#allocation5 + $0x88] sm:$0xf]  ;;  %v1919_v16 = vld [vmem:[#allocation5 + $0x94] sm:$0xf0] }
 0x10c   :  { %v1607_v52 = vor.u32 %v1929_v36, %v1604_v40  ;;  %v1555_v18 = vor.u32 %v1919_v16, %v1554_v15  ;;  %v1953_v24 = vld [vmem:[#allocation5 + $0x1ac] sm:$0xf]  ;;  %v1700_v25 = vld [vmem:[#allocation5 + $0x1b8] sm:$0xf0]  ;;  %v1911_v40 = vld [vmem:[#allocation5 + $0x54] sm:$0xf0] }
 0x10d   :  { %v228_v28 = vadd.f32 %v224_v11, %v206_v20  ;;  %v229_v29 = vadd.f32 %v225_v12, %v219_v21  ;;  %927 = vmatpush.bf16.msra.mxu3 %v1631_v37  ;;  %v1957_v11 = vld [vmem:[#allocation5 + $0x1cc] sm:$0xf]  ;;  %v1715_v12 = vor.u32 %v1959_v10, %v1714_v9  ;;  %v1559_v20 = vor.u32 %v1917_v17, %v1556_v19  ;;  %v1698_v21 = vld [vmem:[#allocation5 + $0x1a8] sm:$0xf]  ;;  %v1684_v37 = vld [vmem:[#allocation5 + $0x198] sm:$0xf0] }
 0x10e   :  { %v1719_v14 = vor.u32 %v1957_v11, %v1716_v13  ;;  %v1699_v23 = vor.u32 %v1955_v22, %v1698_v21  ;;  %v1703_v26 = vor.u32 %v1953_v24, %v1700_v25  ;;  %v1949_v36 = vld [vmem:[#allocation5 + $0x18c] sm:$0xf]  ;;  %v1636_v9 = vld [vmem:[#allocation5 + $0x138] sm:$0xf0]  ;;  %v1618_v11 = vld [vmem:[#allocation5 + $0x108] sm:$0xf] }
 0x10f   :  { %v230_v38 = vmax.f32 %v228_v28, 0.0  ;;  %v231_v39 = vmax.f32 %v229_v29, 0.0  ;;  %v1915_v28 = vld [vmem:[#allocation5 + $0x74] sm:$0xf0]  ;;  %v1913_v29 = vld [vmem:[#allocation5 + $0x6c] sm:$0xf]  ;;  %v1639_v10 = vor.u32 %v1937_v7, %v1636_v9 }
 0x110   :  { %v1539_v30 = vor.u32 %v1915_v28, %v1538_v27  ;;  %v1543_v32 = vor.u32 %v1913_v29, %v1540_v31  ;;  %v1933_v13 = vld [vmem:[#allocation5 + $0x10c] sm:$0xf]  ;;  %v1620_v16 = vld [vmem:[#allocation5 + $0x118] sm:$0xf0] }
 0x111   :  { %v232_v45 = vpack.c.bf16 %v230_v38, %v230_v38  ;;  %v233_v46 = vpack.c.bf16 %v231_v39, %v231_v39  ;;  %928 = vmatpush.bf16.msra.mxu3 %v1615_v58  ;;  %v1687_v38 = vor.u32 %v1949_v36, %v1684_v37  ;;  %v1522_v39 = vld [vmem:[#allocation5 + $0x48] sm:$0xf]  ;;  %v1511_v58 = vor.u32 %v1905_v53, %v1508_v55  ;;  %v1987_v25 = vld [vmem:[#allocation7 + $0x38] sm:$0xff]  ;;  %v1982_v53 = vld [vmem:[#allocation7 + $0x10] sm:$0xff] }
 0x112   :  { %v157_v49 = vpop.f32.mrf.mxu0  ;;  %v170_v50 = vpop.f32.mrf.mxu1  ;;  %v1523_v42 = vor.u32 %v1911_v40, %v1522_v39  ;;  %v1623_v17 = vor.u32 %v1933_v13, %v1620_v16  ;;  %v1994_v40 = vld [vmem:[#allocation7 + $0x70] sm:$0xff]  ;;  %v1967_v55 = vld [vmem:[#allocation8 + $0x18] sm:$0xff] }
 0x113   :  { %440 = vmatmul.bf16.vlgmr.msrb.gmra.mxu0 %v232_v45  ;;  %453 = vmatmul.bf16.vlgmr.msrb.gmra.mxu1 %v233_v46  ;;  %v1668_v49 = vld [vmem:[#allocation5 + $0x178] sm:$0xf0] }
 0x114   :  { %466 = vmatmul.bf16.vlgmr.msrb.gmra.mxu2 %v232_v45  ;;  %479 = vmatmul.bf16.vlgmr.msrb.gmra.mxu3 %v233_v46  ;;  %v1666_v45 = vld [vmem:[#allocation5 + $0x168] sm:$0xf]  ;;  %v1947_v46 = vld [vmem:[#allocation5 + $0x174] sm:$0xf0]  ;;  %v1671_v50 = vor.u32 %v1945_v47, %v1668_v49 }
 0x115   :  { %934 = vmatpush.bf16.msrb.mxu0 %v1603_v51  ;;  %960 = vmatpush.bf16.msrb.mxu2 %v1607_v52  ;;  %v1667_v48 = vor.u32 %v1947_v46, %v1666_v45  ;;  %v1506_v51 = vld [vmem:[#allocation5 + $0x28] sm:$0xf]  ;;  %v1907_v52 = vld [vmem:[#allocation5 + $0x34] sm:$0xf0]  ;;  %v1984_v45 = vld [vmem:[#allocation7 + $0x20] sm:$0xff] }
 0x116   :  { %947 = vmatpush.bf16.msrb.mxu1 %v1731_v0  ;;  %973 = vmatpush.bf16.msrb.mxu3 %v1735_v2  ;;  %v1507_v54 = vor.u32 %v1907_v52, %v1506_v51  ;;  %v1903_v0 = vld [vmem:[#allocation5 + $0x14] sm:$0xf0]  ;;  %v1492_v2 = vld [vmem:[#allocation5 + $0x18] sm:$0xf0]  ;;  %v1992_v46 = vld [vmem:[#allocation7 + $0x60] sm:$0xff] }
 0x117   :  { %v1491_v3 = vor.u32 %v1903_v0, %v1490_v62  ;;  %v1495_v4 = vor.u32 %v1901_v1, %v1492_v2  ;;  %v1969_v47 = vld [vmem:[#allocation8 + $0x28] sm:$0xff]  ;;  %v1983_v49 = vld [vmem:[#allocation7 + $0x18] sm:$0xff]  ;;  %v1968_v51 = vld [vmem:[#allocation8 + $0x20] sm:$0xff] }
 0x118   :  { %v1977_v52 = vld [vmem:[#allocation8 + $0x68] sm:$0xff]  ;;  %v1988_v62 = vld [vmem:[#allocation7 + $0x40] sm:$0xff]  ;;  %v1974_v0 = vld [vmem:[#allocation8 + $0x50] sm:$0xff] }
 0x119   :  { %935 = vmatpush.bf16.msrb.mxu0 %v1587_v59  ;;  %961 = vmatpush.bf16.msrb.mxu2 %v1591_v60  ;;  %v1651_v59 = vor.u32 %v1943_v57, %v1650_v56  ;;  %v1941_v60 = vld [vmem:[#allocation5 + $0x14c] sm:$0xf]  ;;  %v1976_v56 = vld [vmem:[#allocation8 + $0x60] sm:$0xff] }
 0x11a   :  { %948 = vmatpush.bf16.msrb.mxu1 %v1715_v12  ;;  %974 = vmatpush.bf16.msrb.mxu3 %v1719_v14  ;;  %v1655_v63 = vor.u32 %v1941_v60, %v1652_v61  ;;  %v1935_v12 = vld [vmem:[#allocation5 + $0x114] sm:$0xf0]  ;;  %v266_v14 = vld [vmem:[%s2446_s6] sm:$0x3]  ;;  %v1981_v57 = vld [vmem:[#allocation7 + $0x8] sm:$0xff] }
 0x11b   :  { %v1619_v15 = vor.u32 %v1935_v12, %v1618_v11  ;;  %v1975_v60 = vld [vmem:[#allocation8 + $0x58] sm:$0xff]  ;;  %v1980_v61 = vld [vmem:[#allocation7] sm:$0xff]  ;;  %v1973_v2 = vld [vmem:[#allocation8 + $0x48] sm:$0xff] }
 0x11c   :  { %v1964_v1 = vld [vmem:[#allocation8] sm:$0xff] }
 0x11d   :  { %936 = vmatpush.bf16.msrb.mxu0 %v1571_v6  ;;  %962 = vmatpush.bf16.msrb.mxu2 %v1575_v8  ;;  %v1939_v6 = vld [vmem:[#allocation5 + $0x134] sm:$0xf0] }
 0x11e   :  { %949 = vmatpush.bf16.msrb.mxu1 %v1699_v23  ;;  %975 = vmatpush.bf16.msrb.mxu3 %v1703_v26  ;;  %v1635_v8 = vor.u32 %v1939_v6, %v1634_v5  ;;  %v269_v23 = vperm.slane %v266_v14, 1  ;;  %v1971_v26 = vld [vmem:[#allocation8 + $0x38] sm:$0xff]  ;;  %v552_v5 = vld [vmem:[%s2448_s8] sm:$0xf] }
 0x11f   :  { %v554_v6 = vperm.slane %v552_v5, 0  ;;  %v555_v9 = vperm.slane %v552_v5, 1 }
 0x121   :  { %937 = vmatpush.bf16.msrb.mxu0 %v1555_v18  ;;  %963 = vmatpush.bf16.msrb.mxu2 %v1559_v20  ;;  %v268_v18 = vperm.slane %v266_v14, 0 }
 0x122   :  { %950 = vmatpush.bf16.msrb.mxu1 %v1683_v35  ;;  %976 = vmatpush.bf16.msrb.mxu3 %v1687_v38  ;;  %v1995_v35 = vld [vmem:[#allocation7 + $0x78] sm:$0xff] }
 0x125   :  { %938 = vmatpush.bf16.msrb.mxu0 %v1539_v30  ;;  %964 = vmatpush.bf16.msrb.mxu2 %v1543_v32 }
 0x126   :  { %951 = vmatpush.bf16.msrb.mxu1 %v1667_v48  ;;  %977 = vmatpush.bf16.msrb.mxu3 %v1671_v50  ;;  %v1978_v48 = vld [vmem:[#allocation8 + $0x70] sm:$0xff]  ;;  %v1991_v50 = vld [vmem:[#allocation7 + $0x58] sm:$0xff] }
 0x129   :  { %939 = vmatpush.bf16.msrb.mxu0 %v1523_v42  ;;  %965 = vmatpush.bf16.msrb.mxu2 %v1527_v44  ;;  %v1993_v42 = vld [vmem:[#allocation7 + $0x68] sm:$0xff]  ;;  %v1979_v44 = vld [vmem:[#allocation8 + $0x78] sm:$0xff] }
 0x12a   :  { %952 = vmatpush.bf16.msrb.mxu1 %v1651_v59  ;;  %978 = vmatpush.bf16.msrb.mxu3 %v1655_v63  ;;  %v1966_v59 = vld [vmem:[#allocation8 + $0x10] sm:$0xff]  ;;  %v1965_v63 = vld [vmem:[#allocation8 + $0x8] sm:$0xff] }
 0x12d   :  { %940 = vmatpush.bf16.msrb.mxu0 %v1507_v54  ;;  %966 = vmatpush.bf16.msrb.mxu2 %v1511_v58  ;;  %v1990_v54 = vld [vmem:[#allocation7 + $0x50] sm:$0xff]  ;;  %v1989_v58 = vld [vmem:[#allocation7 + $0x48] sm:$0xff] }
 0x12e   :  { %953 = vmatpush.bf16.msrb.mxu1 %v1635_v8  ;;  %979 = vmatpush.bf16.msrb.mxu3 %v1639_v10 }
 0x131   :  { %941 = vmatpush.bf16.msrb.mxu0 %v1491_v3  ;;  %967 = vmatpush.bf16.msrb.mxu2 %v1495_v4  ;;  %v1972_v3 = vld [vmem:[#allocation8 + $0x40] sm:$0xff] }
 0x132   :  { %954 = vmatpush.bf16.msrb.mxu1 %v1619_v15  ;;  %980 = vmatpush.bf16.msrb.mxu3 %v1623_v17 }
 0x190   :  { %v441_v19 = vpop.f32.mrf.mxu0  ;;  %v454_v20 = vpop.f32.mrf.mxu1 }
 0x191   :  { %v442_v21 = vadd.f32 %v441_v19, %v268_v18 }
 0x193   :  { %v455_v22 = vadd.f32 %v454_v20, %v442_v21 }
 0x195   :  { %v484_v24 = vmax.f32 %v455_v22, 0.0  ;;  %v556_v22 = vperm.slane %v552_v5, 2 }
 0x197   :  { %v486_v27 = vpack.c.bf16 %v484_v24, %v484_v24  ;;  %v467_v28 = vpop.f32.mrf.mxu2  ;;  %v480_v29 = vpop.f32.mrf.mxu3 }
 0x198   :  { %v468_v30 = vadd.f32 %v467_v28, %v269_v23  ;;  %v443_v31 = vpop.f32.mrf.mxu0  ;;  %v456_v32 = vpop.f32.mrf.mxu1 }
 0x199   :  { %890 = vmatmul.bf16.vlgmr.msra.gmra.mxu0 %v486_v27  ;;  %916 = vmatmul.bf16.vlgmr.msra.gmra.mxu2 %v486_v27  ;;  %v557_v32 = vperm.slane %v552_v5, 3 }
 0x19a   :  { %v481_v33 = vadd.f32 %v480_v29, %v468_v30  ;;  %1293 = vmatpush.bf16.msra.mxu2 %v1987_v25  ;;  %1126 = vmatpush.bf16.msra.mxu0 %v1971_v26 }
 0x19c   :  { %v485_v36 = vmax.f32 %v481_v33, 0.0 }
 0x19e   :  { %v487_v37 = vpack.c.bf16 %v485_v36, %v485_v36  ;;  %1294 = vmatpush.bf16.msra.mxu2 %v1986_v34  ;;  %1127 = vmatpush.bf16.msra.mxu0 %v1970_v43 }
 0x19f   :  { %v469_v38 = vpop.f32.mrf.mxu2  ;;  %v482_v39 = vpop.f32.mrf.mxu3 }
 0x1a0   :  { %903 = vmatmul.bf16.vlgmr.msra.gmra.mxu1 %v487_v37  ;;  %929 = vmatmul.bf16.vlgmr.msra.gmra.mxu3 %v487_v37 }
 0x1a1   :  { %1306 = vmatpush.bf16.msra.mxu3 %v1995_v35  ;;  %1139 = vmatpush.bf16.msra.mxu1 %v1979_v44  ;;  %v2010_v44 = vld [vmem:[%s2450_s10] ss:$0 sm:$0xff] }
 0x1a2   :  { %1295 = vmatpush.bf16.msra.mxu2 %v1985_v41  ;;  %1128 = vmatpush.bf16.msra.mxu0 %v1969_v47  ;;  %v2009_v47 = vld [vmem:[%s2452_s12] ss:$0 sm:$0xff] }
 0x1a5   :  { %1307 = vmatpush.bf16.msra.mxu3 %v1994_v40  ;;  %1140 = vmatpush.bf16.msra.mxu1 %v1978_v48 }
 0x1a6   :  { %1296 = vmatpush.bf16.msra.mxu2 %v1984_v45  ;;  %1129 = vmatpush.bf16.msra.mxu0 %v1968_v51 }
 0x1a9   :  { %942 = vmatmul.bf16.vlgmr.msrb.gmra.mxu0 %v486_v27  ;;  %968 = vmatmul.bf16.vlgmr.msrb.gmra.mxu2 %v486_v27 }
 0x1aa   :  { %1308 = vmatpush.bf16.msra.mxu3 %v1993_v42  ;;  %1297 = vmatpush.bf16.msra.mxu2 %v1983_v49 }
 0x1ab   :  { %1141 = vmatpush.bf16.msra.mxu1 %v1977_v52  ;;  %1130 = vmatpush.bf16.msra.mxu0 %v1967_v55 }
 0x1ae   :  { %1309 = vmatpush.bf16.msra.mxu3 %v1992_v46  ;;  %1298 = vmatpush.bf16.msra.mxu2 %v1982_v53 }
 0x1af   :  { %1142 = vmatpush.bf16.msra.mxu1 %v1976_v56  ;;  %1131 = vmatpush.bf16.msra.mxu0 %v1966_v59 }
 0x1b0   :  { %955 = vmatmul.bf16.vlgmr.msrb.gmra.mxu1 %v487_v37  ;;  %981 = vmatmul.bf16.vlgmr.msrb.gmra.mxu3 %v487_v37 }
 0x1b2   :  { %1310 = vmatpush.bf16.msra.mxu3 %v1991_v50  ;;  %1299 = vmatpush.bf16.msra.mxu2 %v1981_v57 }
 0x1b3   :  { %1143 = vmatpush.bf16.msra.mxu1 %v1975_v60  ;;  %1132 = vmatpush.bf16.msra.mxu0 %v1965_v63 }
 0x1b6   :  { %1311 = vmatpush.bf16.msra.mxu3 %v1990_v54  ;;  %1300 = vmatpush.bf16.msra.mxu2 %v1980_v61 }
 0x1b7   :  { %1144 = vmatpush.bf16.msra.mxu1 %v1974_v0  ;;  %1133 = vmatpush.bf16.msra.mxu0 %v1964_v1 }
 0x1ba   :  { %1312 = vmatpush.bf16.msra.mxu3 %v1989_v58 }
 0x1bb   :  { %1145 = vmatpush.bf16.msra.mxu1 %v1973_v2 }
 0x1be   :  { %1313 = vmatpush.bf16.msra.mxu3 %v1988_v62 }
 0x1bf   :  { %1146 = vmatpush.bf16.msra.mxu1 %v1972_v3 }
 0x216   :  { %v891_v4 = vpop.f32.mrf.mxu0 }
 0x217   :  { %v892_v11 = vadd.f32 %v891_v4, %v554_v6 }
 0x21c   :  { %v917_v7 = vpop.f32.mrf.mxu2 }
 0x21d   :  { %v904_v8 = vpop.f32.mrf.mxu1  ;;  %v918_v13 = vadd.f32 %v917_v7, %v555_v9 }
 0x21e   :  { %v893_v10 = vpop.f32.mrf.mxu0  ;;  %v905_v12 = vadd.f32 %v904_v8, %v892_v11 }
 0x220   :  { %v986_v18 = vmax.f32 %v905_v12, 0.0 }
 0x223   :  { %v930_v14 = vpop.f32.mrf.mxu3 }
 0x224   :  { %v931_v15 = vadd.f32 %v930_v14, %v918_v13  ;;  %v919_v16 = vpop.f32.mrf.mxu2 }
 0x225   :  { %v906_v17 = vpop.f32.mrf.mxu1 }
 0x226   :  { %v987_v19 = vmax.f32 %v931_v15, 0.0  ;;  %v943_v20 = vpop.f32.mrf.mxu0 }
 0x227   :  { %v944_v28 = vadd.f32 %v943_v20, %v556_v22 }
 0x228   :  { %v990_v21 = vpack.c.bf16 %v987_v19, %v986_v18 }
 0x22a   :  { %v1191_v23 = vunpack.c.l.b16 %v990_v21  ;;  %v1192_v24 = vunpack.c.h.b16 %v990_v21 }
 0x22b   :  { %v932_v25 = vpop.f32.mrf.mxu3 }
 0x22c   :  { %v1193_v26 = vpack.c.b16 %v1191_v23, %v1191_v23  ;;  %v1194_v27 = vpack.c.b16 %v1192_v24, %v1192_v24  ;;  %v969_v29 = vpop.f32.mrf.mxu2 }
 0x22d   :  { %v956_v30 = vpop.f32.mrf.mxu1  ;;  %v970_v35 = vadd.f32 %v969_v29, %v557_v32 }
 0x22e   :  { %v957_v31 = vadd.f32 %v956_v30, %v944_v28  ;;  %1301 = vmatmul.bf16.vlgmr.msra.gmra.mxu2 %v1193_v26  ;;  %1314 = vmatmul.bf16.vlgmr.msra.gmra.mxu3 %v1194_v27  ;;  %v945_v33 = vpop.f32.mrf.mxu0 }
 0x230   :  { %v988_v34 = vmax.f32 %v957_v31, 0.0 }
 0x232   :  { %v992_v36 = vpack.c.bf16 %v988_v34, %v988_v34 }
 0x233   :  { %v982_v37 = vpop.f32.mrf.mxu3 }
 0x234   :  { %v983_v38 = vadd.f32 %v982_v37, %v970_v35  ;;  %1134 = vmatmul.bf16.vlgmr.msra.gmra.mxu0 %v992_v36  ;;  %v971_v39 = vpop.f32.mrf.mxu2 }
 0x235   :  { %v958_v40 = vpop.f32.mrf.mxu1 }
 0x236   :  { %v989_v41 = vmax.f32 %v983_v38, 0.0 }
 0x238   :  { %v993_v42 = vpack.c.bf16 %v989_v41, %v989_v41 }
 0x23a   :  { %1147 = vmatmul.bf16.vlgmr.msra.gmra.mxu1 %v993_v42 }
 0x23b   :  { %v984_v43 = vpop.f32.mrf.mxu3 }
 0x2b1   :  { %v1135_v45 = vpop.f32.mrf.mxu0  ;;  %v1302_v46 = vpop.f32.mrf.mxu2 }
 0x2b2   :  { %v1303_v48 = vadd.f32 %v2010_v44, %v1302_v46  ;;  %v1315_v49 = vpop.f32.mrf.mxu3  ;;  %v1136_v51 = vadd.f32 %v2009_v47, %v1135_v45 }
 0x2b4   :  { %v1316_v50 = vadd.f32 %v1315_v49, %v1303_v48 }
 0x2b6   :  { %1319 = vst [vmem:[%s2453_s13] sm:$0xff] %v1316_v50 }
 0x2b7   :  { %v1148_v52 = vpop.f32.mrf.mxu1 }
 0x2b8   :  { %v1149_v53 = vadd.f32 %v1148_v52, %v1136_v51 }
 0x2b9   :  { %v1137_v54 = vpop.f32.mrf.mxu0  ;;  %v1304_v55 = vpop.f32.mrf.mxu2 }
 0x2ba   :  { %1152 = vst [vmem:[%s2454_s14] sm:$0xff] %v1149_v53  ;;  %v1317_v56 = vpop.f32.mrf.mxu3 }
 0x2bf   :  { %v1150_v57 = vpop.f32.mrf.mxu1 }
 0x2c0   :  { %1328 = vsyncpa [#allocation4], 1 }
 0x2c1   :  { %1329 = vsyncpa [#allocation6], 1 }
 0x2c2   :  { %1330 = vsyncpa [#allocation9], 1 }

</bundles_post_ra>
